<compile_context>
chip_gen: v6e
topology: v6e:2x2x1
jax: 0.10.0
libtpu: 0.0.40
codegen_flags: <defaults>
</compile_context>

<pallas_src>
import math
import functools

import jax
import jax.numpy as jnp
from jax.experimental import pallas as pl
from jax.experimental.pallas import tpu as pltpu


# --------------------------------------------------------------------------
# Kernel helpers
# --------------------------------------------------------------------------
def _project_kv(xkv, wkv_ref, bkv_ref, k_hm, v_hm, num_heads, head_dim):
    """Fused full-width K|V projection + one-time relayout into head-major scratch.

    Runs once per image (guarded by pl.when on the tiled path), NOT once per
    query tile, so both the ~2*S*H*H projection FLOPs and the unaligned
    64-lane head slices below are paid a single time per image.
    """
    H = num_heads * head_dim
    kv = jnp.dot(xkv, wkv_ref[...], preferred_element_type=jnp.float32) + bkv_ref[...]
    kvb = kv.astype(jnp.bfloat16)
    # Tiny static loop: each iteration is just a slice + store of one (S, d)
    # slab, nothing long-lived stays in vregs across iterations.
    for h in range(num_heads):
        lo = h * head_dim
        k_hm[h] = kvb[:, lo:lo + head_dim]
        v_hm[h] = kvb[:, H + lo:H + lo + head_dim]


def _attend(xq, wq_ref, bq_ref, wo_ref, bo_ref, o_ref,
            q_hm, k_hm, v_hm, ctx_scr, num_heads, head_dim):
    H = num_heads * head_dim

    # Q projection: full-depth, full-width MXU matmul (M=TQ, K=H, N=H).
    # 1/sqrt(d) is already folded into wq/bq on the host.
    q = jnp.dot(xq, wq_ref[...], preferred_element_type=jnp.float32) + bq_ref[...]
    qb = q.astype(jnp.bfloat16)
    for h in range(num_heads):                      # tiny relayout stores only
        q_hm[h] = qb[:, h * head_dim:(h + 1) * head_dim]

    # Head-batched attention core: the head axis is the (leading) batch dim of
    # both dot_generals, so all per-head slices are aligned leading-dim views
    # and there is no unrolled per-head Python loop holding (TQ, S) temps.
    s = jnp.einsum("hqd,hkd->hqk", q_hm[...], k_hm[...],
                   preferred_element_type=jnp.float32)          # (nh, TQ, S)
    s = s - jnp.max(s, axis=-1, keepdims=True)
    e = jnp.exp(s)
    inv = pl.reciprocal(jnp.sum(e, axis=-1, keepdims=True), approx=True)
    p = (e * inv).astype(jnp.bfloat16)
    ctx = jnp.einsum("hqk,hkd->hqd", p, v_hm[...],
                     preferred_element_type=jnp.float32)        # (nh, TQ, d)

    # Re-interleave contexts to (TQ, H) so the output projection is ONE
    # full-depth (K=H) MXU matmul instead of nh K=head_dim matmuls.
    for h in range(num_heads):
        ctx_scr[:, h * head_dim:(h + 1) * head_dim] = ctx[h].astype(ctx_scr.dtype)

    out = jnp.dot(ctx_scr[...], wo_ref[...],
                  preferred_element_type=jnp.float32) + bo_ref[...]
    o_ref[0] = out.astype(o_ref.dtype)


def _kernel_single(x_ref, wq_ref, bq_ref, wkv_ref, bkv_ref, wo_ref, bo_ref,
                   o_ref, q_hm, k_hm, v_hm, ctx_scr, *, num_heads, head_dim):
    # Single query tile covering the whole sequence: query rows are read from
    # the same block as K/V rows (x DMA'd once), and the KV projection is done
    # exactly once per image.
    x = x_ref[0]                                    # (S, H) bf16
    _project_kv(x, wkv_ref, bkv_ref, k_hm, v_hm, num_heads, head_dim)
    _attend(x, wq_ref, bq_ref, wo_ref, bo_ref, o_ref,
            q_hm, k_hm, v_hm, ctx_scr, num_heads, head_dim)


def _kernel_tiled(xq_ref, xkv_ref, wq_ref, bq_ref, wkv_ref, bkv_ref, wo_ref,
                  bo_ref, o_ref, q_hm, k_hm, v_hm, ctx_scr, *,
                  num_heads, head_dim):
    # KV projection hoisted out of the query-tile axis: computed only at t==0
    # and kept resident in head-major scratch across the "arbitrary" t axis.
    @pl.when(pl.program_id(1) == 0)
    def _():
        _project_kv(xkv_ref[0], wkv_ref, bkv_ref, k_hm, v_hm,
                    num_heads, head_dim)

    _attend(xq_ref[0], wq_ref, bq_ref, wo_ref, bo_ref, o_ref,
            q_hm, k_hm, v_hm, ctx_scr, num_heads, head_dim)


# --------------------------------------------------------------------------
# Wrapper
# --------------------------------------------------------------------------
def vit_attention(x, params, num_heads, *, tq_max=256):
    """x: (B, S, H) float32.  params: dict of f32 weights/biases.  Returns (B, S, H) f32."""
    B, S, H = x.shape
    head_dim = H // num_heads
    scale = 1.0 / math.sqrt(head_dim)

    # bf16 MXU inputs (f32 accumulation inside the kernel); 1/sqrt(d) folded
    # into the Q projection on the host.
    xb = x.astype(jnp.bfloat16)
    wq = (params["wq"] * scale).astype(jnp.bfloat16)
    bq = (params["bq"] * scale).astype(jnp.float32)
    wkv = jnp.concatenate([params["wk"], params["wv"]], axis=1).astype(jnp.bfloat16)
    bkv = jnp.concatenate([params["bk"], params["bv"]], axis=1).astype(jnp.float32)
    wo = params["wo"].astype(jnp.bfloat16)
    bo = params["bo"].astype(jnp.float32)

    const = lambda *_: (0, 0)          # constant-index weights: no re-DMA across grid
    weight_specs = [
        pl.BlockSpec((H, H), const),         # wq (scaled)
        pl.BlockSpec((1, H), const),         # bq (scaled)
        pl.BlockSpec((H, 2 * H), const),     # wkv (fused K|V)
        pl.BlockSpec((1, 2 * H), const),     # bkv (fused K|V)
        pl.BlockSpec((H, H), const),         # wo
        pl.BlockSpec((1, H), const),         # bo
    ]

    def scratch_shapes(tq):
        return [
            pltpu.VMEM((num_heads, tq, head_dim), jnp.bfloat16),  # Q, head-major
            pltpu.VMEM((num_heads, S, head_dim), jnp.bfloat16),   # K, head-major (persists)
            pltpu.VMEM((num_heads, S, head_dim), jnp.bfloat16),   # V, head-major (persists)
            pltpu.VMEM((tq, H), jnp.bfloat16),                    # interleaved context
        ]

    # 48 MiB <= the recommended ~52-56 MiB ceiling for v7x (64 MiB/TC) and well
    # under v5e/v6e's 128 MiB physical VMEM.
    def cparams(sem):
        return pltpu.CompilerParams(dimension_semantics=sem,
                                    vmem_limit_bytes=48 * 1024 * 1024)

    if S <= tq_max:
        # --- Single-tile path (typical ViT, e.g. S=197): no padding, no KV
        # recompute, no duplicate activation DMA; batch axis is "parallel" so
        # v7x megacore shards over images.
        kernel = functools.partial(_kernel_single, num_heads=num_heads,
                                   head_dim=head_dim)
        return pl.pallas_call(
            kernel,
            out_shape=jax.ShapeDtypeStruct((B, S, H), x.dtype),
            grid_spec=pltpu.PrefetchScalarGridSpec(
                num_scalar_prefetch=0,
                grid=(B,),
                in_specs=[pl.BlockSpec((1, S, H), lambda b: (b, 0, 0))] + weight_specs,
                out_specs=pl.BlockSpec((1, S, H), lambda b: (b, 0, 0)),
                scratch_shapes=scratch_shapes(S),
            ),
            compiler_params=cparams(("parallel",)),
        )(xb, wq, bq, wkv, bkv, wo, bo)

    # --- Tiled path (long sequences): pick tq as the multiple of 8 closest to
    # S / n_q so query padding is minimal (e.g. S=197, tq_max=128 -> tq=104,
    # s_pad=208 instead of 256).
    n_q = pl.cdiv(S, tq_max)
    tq = pl.cdiv(pl.cdiv(S, n_q), 8) * 8
    s_pad = n_q * tq
    xq = jnp.pad(xb, ((0, 0), (0, s_pad - S), (0, 0))) if s_pad != S else xb

    kernel = functools.partial(_kernel_tiled, num_heads=num_heads,
                               head_dim=head_dim)
    out = pl.pallas_call(
        kernel,
        out_shape=jax.ShapeDtypeStruct((B, s_pad, H), x.dtype),
        grid_spec=pltpu.PrefetchScalarGridSpec(
            num_scalar_prefetch=0,
            grid=(B, n_q),
            in_specs=[pl.BlockSpec((1, tq, H), lambda b, t: (b, t, 0)),   # query tile
                      pl.BlockSpec((1, S, H), lambda b, t: (b, 0, 0))]    # full seq (K/V)
                     + weight_specs,
            out_specs=pl.BlockSpec((1, tq, H), lambda b, t: (b, t, 0)),
            scratch_shapes=scratch_shapes(tq),
        ),
        # t is "arbitrary" so K/V computed at t==0 stay resident across query
        # tiles; b stays "parallel" for megacore / v7x.  (For B==1 on v7x one
        # could flip t back to "parallel" and accept one KV projection per
        # core to keep both TensorCores busy.)
        compiler_params=cparams(("parallel", "arbitrary")),
    )(xq, xb, wq, bq, wkv, bkv, wo, bo)
    return out[:, :S, :] if s_pad != S else out


# --------------------------------------------------------------------------
# Pure-JAX reference and test harness
# --------------------------------------------------------------------------
def vit_attention_ref(x, params, num_heads):
    """Plain-JAX f32 reference matching the PyTorch forward (dropout = identity)."""
    B, S, H = x.shape
    d = H // num_heads
    q = x @ params["wq"] + params["bq"][0]
    k = x @ params["wk"] + params["bk"][0]
    v = x @ params["wv"] + params["bv"][0]

    def split(t):  # (B, S, H) -> (B, nh, S, d)
        return t.reshape(B, S, num_heads, d).transpose(0, 2, 1, 3)

    qh, kh, vh = split(q), split(k), split(v)
    scores = jnp.einsum("bhqd,bhkd->bhqk", qh, kh) / math.sqrt(d)
    probs = jax.nn.softmax(scores, axis=-1)
    ctx = jnp.einsum("bhqk,bhkd->bhqd", probs, vh)
    ctx = ctx.transpose(0, 2, 1, 3).reshape(B, S, H)
    return ctx @ params["wo"] + params["bo"][0]


def init_params(key, hidden):
    ks = jax.random.split(key, 8)
    scale = 0.05
    return {
        "wq": scale * jax.random.normal(ks[0], (hidden, hidden), jnp.float32),
        "bq": scale * jax.random.normal(ks[1], (1, hidden), jnp.float32),
        "wk": scale * jax.random.normal(ks[2], (hidden, hidden), jnp.float32),
        "bk": scale * jax.random.normal(ks[3], (1, hidden), jnp.float32),
        "wv": scale * jax.random.normal(ks[4], (hidden, hidden), jnp.float32),
        "bv": scale * jax.random.normal(ks[5], (1, hidden), jnp.float32),
        "wo": scale * jax.random.normal(ks[6], (hidden, hidden), jnp.float32),
        "bo": scale * jax.random.normal(ks[7], (1, hidden), jnp.float32),
    }


if __name__ == "__main__":
    key = jax.random.PRNGKey(0)
    k_x1, k_p, k_x2 = jax.random.split(key, 3)

    B, H, NUM_HEADS = 2, 32, 4
    params = init_params(k_p, H)

    # Case 1: single-tile path (whole sequence in one query tile).
    S1 = 8
    x1 = jax.random.normal(k_x1, (B, S1, H), jnp.float32)
    out1 = jax.block_until_ready(vit_attention(x1, params, NUM_HEADS))
    ref1 = vit_attention_ref(x1, params, NUM_HEADS)
    assert out1.shape == (B, S1, H)
    # bf16 MXU inputs + approx reciprocal -> relaxed tolerance vs f32 reference.
    assert jnp.allclose(out1, ref1, atol=2e-2, rtol=2e-2), (
        "single-tile mismatch, max abs diff = %f"
        % float(jnp.max(jnp.abs(out1 - ref1))))

    # Case 2: tiled path (forced small tq_max) exercising the pl.when-guarded
    # KV hoist, query padding (12 -> 16) and the "arbitrary" query-tile axis.
    S2 = 12
    x2 = jax.random.normal(k_x2, (B, S2, H), jnp.float32)
    out2 = jax.block_until_ready(vit_attention(x2, params, NUM_HEADS, tq_max=8))
    ref2 = vit_attention_ref(x2, params, NUM_HEADS)
    assert out2.shape == (B, S2, H)
    assert jnp.allclose(out2, ref2, atol=2e-2, rtol=2e-2), (
        "tiled mismatch, max abs diff = %f"
        % float(jnp.max(jnp.abs(out2 - ref2))))

    print("KERNEL_OK")
</pallas_src>

<mosaic_0001>
module attributes {stable_mosaic.version = 11 : i64} {
  func.func @_kernel_single(%arg0: i32, %arg1: memref<1x8x32xbf16, #tpu.memory_space<vmem>>, %arg2: memref<32x32xbf16, #tpu.memory_space<vmem>>, %arg3: memref<1x32xf32, #tpu.memory_space<vmem>>, %arg4: memref<32x64xbf16, #tpu.memory_space<vmem>>, %arg5: memref<1x64xf32, #tpu.memory_space<vmem>>, %arg6: memref<32x32xbf16, #tpu.memory_space<vmem>>, %arg7: memref<1x32xf32, #tpu.memory_space<vmem>>, %arg8: memref<1x8x32xf32, #tpu.memory_space<vmem>>, %arg9: memref<4x8x8xbf16, #tpu.memory_space<vmem>>, %arg10: memref<4x8x8xbf16, #tpu.memory_space<vmem>>, %arg11: memref<4x8x8xbf16, #tpu.memory_space<vmem>>, %arg12: memref<8x32xbf16, #tpu.memory_space<vmem>>) attributes {dimension_semantics = [#tpu.dimension_semantics<parallel>], iteration_bounds = array<i64: 2>, scalar_prefetch = 0 : i64, scratch_operands = 4 : i64, tpu.core_type = #tpu.core_type<tc>, window_params = [{transform_indices = @transform_0, window_bounds = array<i64: 1, 8, 32>}, {pipeline_mode = #tpu.pipeline_mode<synchronous>, transform_indices = @transform_1, window_bounds = array<i64: 32, 32>}, {pipeline_mode = #tpu.pipeline_mode<synchronous>, transform_indices = @transform_2, window_bounds = array<i64: 1, 32>}, {pipeline_mode = #tpu.pipeline_mode<synchronous>, transform_indices = @transform_3, window_bounds = array<i64: 32, 64>}, {pipeline_mode = #tpu.pipeline_mode<synchronous>, transform_indices = @transform_4, window_bounds = array<i64: 1, 64>}, {pipeline_mode = #tpu.pipeline_mode<synchronous>, transform_indices = @transform_5, window_bounds = array<i64: 32, 32>}, {pipeline_mode = #tpu.pipeline_mode<synchronous>, transform_indices = @transform_6, window_bounds = array<i64: 1, 32>}, {transform_indices = @transform_7, window_bounds = array<i64: 1, 8, 32>}]} {
    %c0 = arith.constant 0 : index
    %c0_0 = arith.constant 0 : index
    %c0_1 = arith.constant 0 : index
    %0 = vector.load %arg1[%c0, %c0_0, %c0_1] : memref<1x8x32xbf16, #tpu.memory_space<vmem>>, vector<1x8x32xbf16>
    %1 = vector.shape_cast %0 : vector<1x8x32xbf16> to vector<8x32xbf16>
    %c0_2 = arith.constant 0 : index
    %c0_3 = arith.constant 0 : index
    %2 = vector.load %arg4[%c0_2, %c0_3] : memref<32x64xbf16, #tpu.memory_space<vmem>>, vector<32x64xbf16>
    %cst = arith.constant dense<0.000000e+00> : vector<8x64xf32>
    %3 = tpu.matmul %1, %2, %cst {dimension_numbers = #tpu.dot_dimension_numbers<[1], [0], [0], [1], [0, 0, 1, 1], [], []>} : vector<8x32xbf16>, vector<32x64xbf16>, vector<8x64xf32> -> vector<8x64xf32>
    %c0_4 = arith.constant 0 : index
    %c0_5 = arith.constant 0 : index
    %4 = vector.load %arg5[%c0_4, %c0_5] : memref<1x64xf32, #tpu.memory_space<vmem>>, vector<1x64xf32>
    %5 = vector.broadcast %4 : vector<1x64xf32> to vector<8x64xf32>
    %6 = arith.addf %3, %5 : vector<8x64xf32>
    %7 = arith.truncf %6 : vector<8x64xf32> to vector<8x64xbf16>
    %8 = vector.extract_strided_slice %7 {offsets = [0, 0], sizes = [8, 8], strides = [1, 1]} : vector<8x64xbf16> to vector<8x8xbf16>
    %c0_6 = arith.constant 0 : index
    %c0_7 = arith.constant 0 : index
    %c0_8 = arith.constant 0 : index
    %9 = vector.load %arg10[%c0_6, %c0_7, %c0_8] : memref<4x8x8xbf16, #tpu.memory_space<vmem>>, vector<1x8x8xbf16>
    %10 = vector.shape_cast %9 : vector<1x8x8xbf16> to vector<8x8xbf16>
    %11 = vector.shape_cast %8 : vector<8x8xbf16> to vector<1x8x8xbf16>
    tpu.vector_store %arg10[%c0_6, %c0_7, %c0_8], %11 {strides = array<i32>} : memref<4x8x8xbf16, #tpu.memory_space<vmem>>, vector<1x8x8xbf16>,
    %12 = vector.extract_strided_slice %7 {offsets = [0, 32], sizes = [8, 8], strides = [1, 1]} : vector<8x64xbf16> to vector<8x8xbf16>
    %c0_9 = arith.constant 0 : index
    %c0_10 = arith.constant 0 : index
    %c0_11 = arith.constant 0 : index
    %13 = vector.load %arg11[%c0_9, %c0_10, %c0_11] : memref<4x8x8xbf16, #tpu.memory_space<vmem>>, vector<1x8x8xbf16>
    %14 = vector.shape_cast %13 : vector<1x8x8xbf16> to vector<8x8xbf16>
    %15 = vector.shape_cast %12 : vector<8x8xbf16> to vector<1x8x8xbf16>
    tpu.vector_store %arg11[%c0_9, %c0_10, %c0_11], %15 {strides = array<i32>} : memref<4x8x8xbf16, #tpu.memory_space<vmem>>, vector<1x8x8xbf16>,
    %16 = vector.extract_strided_slice %7 {offsets = [0, 8], sizes = [8, 8], strides = [1, 1]} : vector<8x64xbf16> to vector<8x8xbf16>
    %c1 = arith.constant 1 : index
    %c0_12 = arith.constant 0 : index
    %c0_13 = arith.constant 0 : index
    %17 = vector.load %arg10[%c1, %c0_12, %c0_13] : memref<4x8x8xbf16, #tpu.memory_space<vmem>>, vector<1x8x8xbf16>
    %18 = vector.shape_cast %17 : vector<1x8x8xbf16> to vector<8x8xbf16>
    %19 = vector.shape_cast %16 : vector<8x8xbf16> to vector<1x8x8xbf16>
    tpu.vector_store %arg10[%c1, %c0_12, %c0_13], %19 {strides = array<i32>} : memref<4x8x8xbf16, #tpu.memory_space<vmem>>, vector<1x8x8xbf16>,
    %20 = vector.extract_strided_slice %7 {offsets = [0, 40], sizes = [8, 8], strides = [1, 1]} : vector<8x64xbf16> to vector<8x8xbf16>
    %c1_14 = arith.constant 1 : index
    %c0_15 = arith.constant 0 : index
    %c0_16 = arith.constant 0 : index
    %21 = vector.load %arg11[%c1_14, %c0_15, %c0_16] : memref<4x8x8xbf16, #tpu.memory_space<vmem>>, vector<1x8x8xbf16>
    %22 = vector.shape_cast %21 : vector<1x8x8xbf16> to vector<8x8xbf16>
    %23 = vector.shape_cast %20 : vector<8x8xbf16> to vector<1x8x8xbf16>
    tpu.vector_store %arg11[%c1_14, %c0_15, %c0_16], %23 {strides = array<i32>} : memref<4x8x8xbf16, #tpu.memory_space<vmem>>, vector<1x8x8xbf16>,
    %24 = vector.extract_strided_slice %7 {offsets = [0, 16], sizes = [8, 8], strides = [1, 1]} : vector<8x64xbf16> to vector<8x8xbf16>
    %c2 = arith.constant 2 : index
    %c0_17 = arith.constant 0 : index
    %c0_18 = arith.constant 0 : index
    %25 = vector.load %arg10[%c2, %c0_17, %c0_18] : memref<4x8x8xbf16, #tpu.memory_space<vmem>>, vector<1x8x8xbf16>
    %26 = vector.shape_cast %25 : vector<1x8x8xbf16> to vector<8x8xbf16>
    %27 = vector.shape_cast %24 : vector<8x8xbf16> to vector<1x8x8xbf16>
    tpu.vector_store %arg10[%c2, %c0_17, %c0_18], %27 {strides = array<i32>} : memref<4x8x8xbf16, #tpu.memory_space<vmem>>, vector<1x8x8xbf16>,
    %28 = vector.extract_strided_slice %7 {offsets = [0, 48], sizes = [8, 8], strides = [1, 1]} : vector<8x64xbf16> to vector<8x8xbf16>
    %c2_19 = arith.constant 2 : index
    %c0_20 = arith.constant 0 : index
    %c0_21 = arith.constant 0 : index
    %29 = vector.load %arg11[%c2_19, %c0_20, %c0_21] : memref<4x8x8xbf16, #tpu.memory_space<vmem>>, vector<1x8x8xbf16>
    %30 = vector.shape_cast %29 : vector<1x8x8xbf16> to vector<8x8xbf16>
    %31 = vector.shape_cast %28 : vector<8x8xbf16> to vector<1x8x8xbf16>
    tpu.vector_store %arg11[%c2_19, %c0_20, %c0_21], %31 {strides = array<i32>} : memref<4x8x8xbf16, #tpu.memory_space<vmem>>, vector<1x8x8xbf16>,
    %32 = vector.extract_strided_slice %7 {offsets = [0, 24], sizes = [8, 8], strides = [1, 1]} : vector<8x64xbf16> to vector<8x8xbf16>
    %c3 = arith.constant 3 : index
    %c0_22 = arith.constant 0 : index
    %c0_23 = arith.constant 0 : index
    %33 = vector.load %arg10[%c3, %c0_22, %c0_23] : memref<4x8x8xbf16, #tpu.memory_space<vmem>>, vector<1x8x8xbf16>
    %34 = vector.shape_cast %33 : vector<1x8x8xbf16> to vector<8x8xbf16>
    %35 = vector.shape_cast %32 : vector<8x8xbf16> to vector<1x8x8xbf16>
    tpu.vector_store %arg10[%c3, %c0_22, %c0_23], %35 {strides = array<i32>} : memref<4x8x8xbf16, #tpu.memory_space<vmem>>, vector<1x8x8xbf16>,
    %36 = vector.extract_strided_slice %7 {offsets = [0, 56], sizes = [8, 8], strides = [1, 1]} : vector<8x64xbf16> to vector<8x8xbf16>
    %c3_24 = arith.constant 3 : index
    %c0_25 = arith.constant 0 : index
    %c0_26 = arith.constant 0 : index
    %37 = vector.load %arg11[%c3_24, %c0_25, %c0_26] : memref<4x8x8xbf16, #tpu.memory_space<vmem>>, vector<1x8x8xbf16>
    %38 = vector.shape_cast %37 : vector<1x8x8xbf16> to vector<8x8xbf16>
    %39 = vector.shape_cast %36 : vector<8x8xbf16> to vector<1x8x8xbf16>
    tpu.vector_store %arg11[%c3_24, %c0_25, %c0_26], %39 {strides = array<i32>} : memref<4x8x8xbf16, #tpu.memory_space<vmem>>, vector<1x8x8xbf16>,
    %c0_27 = arith.constant 0 : index
    %c0_28 = arith.constant 0 : index
    %40 = vector.load %arg2[%c0_27, %c0_28] : memref<32x32xbf16, #tpu.memory_space<vmem>>, vector<32x32xbf16>
    %cst_29 = arith.constant dense<0.000000e+00> : vector<8x32xf32>
    %41 = tpu.matmul %1, %40, %cst_29 {dimension_numbers = #tpu.dot_dimension_numbers<[1], [0], [0], [1], [0, 0, 1, 1], [], []>} : vector<8x32xbf16>, vector<32x32xbf16>, vector<8x32xf32> -> vector<8x32xf32>
    %c0_30 = arith.constant 0 : index
    %c0_31 = arith.constant 0 : index
    %42 = vector.load %arg3[%c0_30, %c0_31] : memref<1x32xf32, #tpu.memory_space<vmem>>, vector<1x32xf32>
    %43 = vector.broadcast %42 : vector<1x32xf32> to vector<8x32xf32>
    %44 = arith.addf %41, %43 : vector<8x32xf32>
    %45 = arith.truncf %44 : vector<8x32xf32> to vector<8x32xbf16>
    %46 = vector.extract_strided_slice %45 {offsets = [0, 0], sizes = [8, 8], strides = [1, 1]} : vector<8x32xbf16> to vector<8x8xbf16>
    %c0_32 = arith.constant 0 : index
    %c0_33 = arith.constant 0 : index
    %c0_34 = arith.constant 0 : index
    %47 = vector.load %arg9[%c0_32, %c0_33, %c0_34] : memref<4x8x8xbf16, #tpu.memory_space<vmem>>, vector<1x8x8xbf16>
    %48 = vector.shape_cast %47 : vector<1x8x8xbf16> to vector<8x8xbf16>
    %49 = vector.shape_cast %46 : vector<8x8xbf16> to vector<1x8x8xbf16>
    tpu.vector_store %arg9[%c0_32, %c0_33, %c0_34], %49 {strides = array<i32>} : memref<4x8x8xbf16, #tpu.memory_space<vmem>>, vector<1x8x8xbf16>,
    %50 = vector.extract_strided_slice %45 {offsets = [0, 8], sizes = [8, 8], strides = [1, 1]} : vector<8x32xbf16> to vector<8x8xbf16>
    %c1_35 = arith.constant 1 : index
    %c0_36 = arith.constant 0 : index
    %c0_37 = arith.constant 0 : index
    %51 = vector.load %arg9[%c1_35, %c0_36, %c0_37] : memref<4x8x8xbf16, #tpu.memory_space<vmem>>, vector<1x8x8xbf16>
    %52 = vector.shape_cast %51 : vector<1x8x8xbf16> to vector<8x8xbf16>
    %53 = vector.shape_cast %50 : vector<8x8xbf16> to vector<1x8x8xbf16>
    tpu.vector_store %arg9[%c1_35, %c0_36, %c0_37], %53 {strides = array<i32>} : memref<4x8x8xbf16, #tpu.memory_space<vmem>>, vector<1x8x8xbf16>,
    %54 = vector.extract_strided_slice %45 {offsets = [0, 16], sizes = [8, 8], strides = [1, 1]} : vector<8x32xbf16> to vector<8x8xbf16>
    %c2_38 = arith.constant 2 : index
    %c0_39 = arith.constant 0 : index
    %c0_40 = arith.constant 0 : index
    %55 = vector.load %arg9[%c2_38, %c0_39, %c0_40] : memref<4x8x8xbf16, #tpu.memory_space<vmem>>, vector<1x8x8xbf16>
    %56 = vector.shape_cast %55 : vector<1x8x8xbf16> to vector<8x8xbf16>
    %57 = vector.shape_cast %54 : vector<8x8xbf16> to vector<1x8x8xbf16>
    tpu.vector_store %arg9[%c2_38, %c0_39, %c0_40], %57 {strides = array<i32>} : memref<4x8x8xbf16, #tpu.memory_space<vmem>>, vector<1x8x8xbf16>,
    %58 = vector.extract_strided_slice %45 {offsets = [0, 24], sizes = [8, 8], strides = [1, 1]} : vector<8x32xbf16> to vector<8x8xbf16>
    %c3_41 = arith.constant 3 : index
    %c0_42 = arith.constant 0 : index
    %c0_43 = arith.constant 0 : index
    %59 = vector.load %arg9[%c3_41, %c0_42, %c0_43] : memref<4x8x8xbf16, #tpu.memory_space<vmem>>, vector<1x8x8xbf16>
    %60 = vector.shape_cast %59 : vector<1x8x8xbf16> to vector<8x8xbf16>
    %61 = vector.shape_cast %58 : vector<8x8xbf16> to vector<1x8x8xbf16>
    tpu.vector_store %arg9[%c3_41, %c0_42, %c0_43], %61 {strides = array<i32>} : memref<4x8x8xbf16, #tpu.memory_space<vmem>>, vector<1x8x8xbf16>,
    %c0_44 = arith.constant 0 : index
    %c0_45 = arith.constant 0 : index
    %c0_46 = arith.constant 0 : index
    %62 = vector.load %arg9[%c0_44, %c0_45, %c0_46] : memref<4x8x8xbf16, #tpu.memory_space<vmem>>, vector<4x8x8xbf16>
    %c0_47 = arith.constant 0 : index
    %c0_48 = arith.constant 0 : index
    %c0_49 = arith.constant 0 : index
    %63 = vector.load %arg10[%c0_47, %c0_48, %c0_49] : memref<4x8x8xbf16, #tpu.memory_space<vmem>>, vector<4x8x8xbf16>
    "tpu.trace_start"() <{level = 10 : i32, message = "hqd,hkd->hqk"}> : () -> ()
    %cst_50 = arith.constant dense<0.000000e+00> : vector<4x8x8xf32>
    %64 = tpu.matmul %62, %63, %cst_50 {dimension_numbers = #tpu.dot_dimension_numbers<[2], [2], [1], [1], [0, 0, 0, 1, 1, 1], [0], [0]>} : vector<4x8x8xbf16>, vector<4x8x8xbf16>, vector<4x8x8xf32> -> vector<4x8x8xf32>
    "tpu.trace_stop"() : () -> ()
    %cst_51 = arith.constant dense<0xFF800000> : vector<4x8xf32>
    %65 = vector.multi_reduction <maximumf>, %64, %cst_51 [2] : vector<4x8x8xf32> to vector<4x8xf32>
    %66 = vector.shape_cast %65 : vector<4x8xf32> to vector<4x8x1xf32>
    %67 = vector.broadcast %66 : vector<4x8x1xf32> to vector<4x8x8xf32>
    %68 = arith.subf %64, %67 : vector<4x8x8xf32>
    %69 = math.exp %68 : vector<4x8x8xf32>
    %cst_52 = arith.constant dense<0.000000e+00> : vector<4x8xf32>
    %70 = vector.multi_reduction <add>, %69, %cst_52 [2] : vector<4x8x8xf32> to vector<4x8xf32>
    %71 = vector.shape_cast %70 : vector<4x8xf32> to vector<4x8x1xf32>
    %72 = tpu.reciprocal %71 {approx = true} : vector<4x8x1xf32> -> vector<4x8x1xf32>
    %73 = vector.broadcast %72 : vector<4x8x1xf32> to vector<4x8x8xf32>
    %74 = arith.mulf %69, %73 : vector<4x8x8xf32>
    %75 = arith.truncf %74 : vector<4x8x8xf32> to vector<4x8x8xbf16>
    %c0_53 = arith.constant 0 : index
    %c0_54 = arith.constant 0 : index
    %c0_55 = arith.constant 0 : index
    %76 = vector.load %arg11[%c0_53, %c0_54, %c0_55] : memref<4x8x8xbf16, #tpu.memory_space<vmem>>, vector<4x8x8xbf16>
    "tpu.trace_start"() <{level = 10 : i32, message = "hqk,hkd->hqd"}> : () -> ()
    %cst_56 = arith.constant dense<0.000000e+00> : vector<4x8x8xf32>
    %77 = tpu.matmul %75, %76, %cst_56 {dimension_numbers = #tpu.dot_dimension_numbers<[2], [1], [1], [2], [0, 0, 0, 1, 1, 2], [0], [0]>} : vector<4x8x8xbf16>, vector<4x8x8xbf16>, vector<4x8x8xf32> -> vector<4x8x8xf32>
    "tpu.trace_stop"() : () -> ()
    %78 = vector.extract_strided_slice %77 {offsets = [0, 0, 0], sizes = [1, 8, 8], strides = [1, 1, 1]} : vector<4x8x8xf32> to vector<1x8x8xf32>
    %79 = vector.shape_cast %78 : vector<1x8x8xf32> to vector<8x8xf32>
    %80 = arith.truncf %79 : vector<8x8xf32> to vector<8x8xbf16>
    %c0_57 = arith.constant 0 : index
    %c0_58 = arith.constant 0 : index
    %81 = vector.load %arg12[%c0_57, %c0_58] : memref<8x32xbf16, #tpu.memory_space<vmem>>, vector<8x8xbf16>
    tpu.vector_store %arg12[%c0_57, %c0_58], %80 {strides = array<i32>} : memref<8x32xbf16, #tpu.memory_space<vmem>>, vector<8x8xbf16>,
    %82 = vector.extract_strided_slice %77 {offsets = [1, 0, 0], sizes = [1, 8, 8], strides = [1, 1, 1]} : vector<4x8x8xf32> to vector<1x8x8xf32>
    %83 = vector.shape_cast %82 : vector<1x8x8xf32> to vector<8x8xf32>
    %84 = arith.truncf %83 : vector<8x8xf32> to vector<8x8xbf16>
    %c0_59 = arith.constant 0 : index
    %c8 = arith.constant 8 : index
    %85 = vector.load %arg12[%c0_59, %c8] : memref<8x32xbf16, #tpu.memory_space<vmem>>, vector<8x8xbf16>
    tpu.vector_store %arg12[%c0_59, %c8], %84 {strides = array<i32>} : memref<8x32xbf16, #tpu.memory_space<vmem>>, vector<8x8xbf16>,
    %86 = vector.extract_strided_slice %77 {offsets = [2, 0, 0], sizes = [1, 8, 8], strides = [1, 1, 1]} : vector<4x8x8xf32> to vector<1x8x8xf32>
    %87 = vector.shape_cast %86 : vector<1x8x8xf32> to vector<8x8xf32>
    %88 = arith.truncf %87 : vector<8x8xf32> to vector<8x8xbf16>
    %c0_60 = arith.constant 0 : index
    %c16 = arith.constant 16 : index
    %89 = vector.load %arg12[%c0_60, %c16] : memref<8x32xbf16, #tpu.memory_space<vmem>>, vector<8x8xbf16>
    tpu.vector_store %arg12[%c0_60, %c16], %88 {strides = array<i32>} : memref<8x32xbf16, #tpu.memory_space<vmem>>, vector<8x8xbf16>,
    %90 = vector.extract_strided_slice %77 {offsets = [3, 0, 0], sizes = [1, 8, 8], strides = [1, 1, 1]} : vector<4x8x8xf32> to vector<1x8x8xf32>
    %91 = vector.shape_cast %90 : vector<1x8x8xf32> to vector<8x8xf32>
    %92 = arith.truncf %91 : vector<8x8xf32> to vector<8x8xbf16>
    %c0_61 = arith.constant 0 : index
    %c24 = arith.constant 24 : index
    %93 = vector.load %arg12[%c0_61, %c24] : memref<8x32xbf16, #tpu.memory_space<vmem>>, vector<8x8xbf16>
    tpu.vector_store %arg12[%c0_61, %c24], %92 {strides = array<i32>} : memref<8x32xbf16, #tpu.memory_space<vmem>>, vector<8x8xbf16>,
    %c0_62 = arith.constant 0 : index
    %c0_63 = arith.constant 0 : index
    %94 = vector.load %arg12[%c0_62, %c0_63] : memref<8x32xbf16, #tpu.memory_space<vmem>>, vector<8x32xbf16>
    %c0_64 = arith.constant 0 : index
    %c0_65 = arith.constant 0 : index
    %95 = vector.load %arg6[%c0_64, %c0_65] : memref<32x32xbf16, #tpu.memory_space<vmem>>, vector<32x32xbf16>
    %cst_66 = arith.constant dense<0.000000e+00> : vector<8x32xf32>
    %96 = tpu.matmul %94, %95, %cst_66 {dimension_numbers = #tpu.dot_dimension_numbers<[1], [0], [0], [1], [0, 0, 1, 1], [], []>} : vector<8x32xbf16>, vector<32x32xbf16>, vector<8x32xf32> -> vector<8x32xf32>
    %c0_67 = arith.constant 0 : index
    %c0_68 = arith.constant 0 : index
    %97 = vector.load %arg7[%c0_67, %c0_68] : memref<1x32xf32, #tpu.memory_space<vmem>>, vector<1x32xf32>
    %98 = vector.broadcast %97 : vector<1x32xf32> to vector<8x32xf32>
    %99 = arith.addf %96, %98 : vector<8x32xf32>
    %c0_69 = arith.constant 0 : index
    %c0_70 = arith.constant 0 : index
    %c0_71 = arith.constant 0 : index
    %100 = vector.load %arg8[%c0_69, %c0_70, %c0_71] : memref<1x8x32xf32, #tpu.memory_space<vmem>>, vector<1x8x32xf32>
    %101 = vector.shape_cast %100 : vector<1x8x32xf32> to vector<8x32xf32>
    %102 = vector.shape_cast %99 : vector<8x32xf32> to vector<1x8x32xf32>
    tpu.vector_store %arg8[%c0_69, %c0_70, %c0_71], %102 {strides = array<i32>} : memref<1x8x32xf32, #tpu.memory_space<vmem>>, vector<1x8x32xf32>,
    return
  }
  func.func @transform_0(%arg0: i32) -> (i32, i32, i32) {
    %c0_i32 = arith.constant 0 : i32
    %c0_i32_0 = arith.constant 0 : i32
    %c0_i32_1 = arith.constant 0 : i32
    return %arg0, %c0_i32, %c0_i32_0 : i32, i32, i32
  }
  func.func @transform_1(%arg0: i32) -> (i32, i32) {
    %c0_i32 = arith.constant 0 : i32
    %c0_i32_0 = arith.constant 0 : i32
    %c0_i32_1 = arith.constant 0 : i32
    return %c0_i32, %c0_i32_0 : i32, i32
  }
  func.func @transform_2(%arg0: i32) -> (i32, i32) {
    %c0_i32 = arith.constant 0 : i32
    %c0_i32_0 = arith.constant 0 : i32
    %c0_i32_1 = arith.constant 0 : i32
    return %c0_i32, %c0_i32_0 : i32, i32
  }
  func.func @transform_3(%arg0: i32) -> (i32, i32) {
    %c0_i32 = arith.constant 0 : i32
    %c0_i32_0 = arith.constant 0 : i32
    %c0_i32_1 = arith.constant 0 : i32
    return %c0_i32, %c0_i32_0 : i32, i32
  }
  func.func @transform_4(%arg0: i32) -> (i32, i32) {
    %c0_i32 = arith.constant 0 : i32
    %c0_i32_0 = arith.constant 0 : i32
    %c0_i32_1 = arith.constant 0 : i32
    return %c0_i32, %c0_i32_0 : i32, i32
  }
  func.func @transform_5(%arg0: i32) -> (i32, i32) {
    %c0_i32 = arith.constant 0 : i32
    %c0_i32_0 = arith.constant 0 : i32
    %c0_i32_1 = arith.constant 0 : i32
    return %c0_i32, %c0_i32_0 : i32, i32
  }
  func.func @transform_6(%arg0: i32) -> (i32, i32) {
    %c0_i32 = arith.constant 0 : i32
    %c0_i32_0 = arith.constant 0 : i32
    %c0_i32_1 = arith.constant 0 : i32
    return %c0_i32, %c0_i32_0 : i32, i32
  }
  func.func @transform_7(%arg0: i32) -> (i32, i32, i32) {
    %c0_i32 = arith.constant 0 : i32
    %c0_i32_0 = arith.constant 0 : i32
    %c0_i32_1 = arith.constant 0 : i32
    return %arg0, %c0_i32, %c0_i32_0 : i32, i32, i32
  }
}

</mosaic_0001>

<bundles_post_ra>
// kernel: tpu_custom_call.1
= control target key start
LH: loop header
LB: loop body
LE: loop exit
PB: predicated region body
PF: predicated region fallthrough
CT: control target
= control target key end

     0   :  { %s1953_s0 = inlined_call_operand.hbm [shape: bf16[2,8,32], index: 0, kind: input, shape index: {}]   ;;  %s1954_s1 = inlined_call_operand.hbm [shape: bf16[32,32], index: 1, kind: input, shape index: {}]   ;;  %s1955_s2 = inlined_call_operand.vmem [shape: f32[1,32], index: 2, kind: input, shape index: {}]   ;;  %s1956_s3 = inlined_call_operand.hbm [shape: bf16[32,64], index: 3, kind: input, shape index: {}]   ;;  %s1957_s4 = inlined_call_operand.vmem [shape: f32[1,64], index: 4, kind: input, shape index: {}]   ;;  %s1958_s5 = inlined_call_operand.hbm [shape: bf16[32,32], index: 5, kind: input, shape index: {}]   ;;  %s1959_s6 = inlined_call_operand.vmem [shape: f32[1,32], index: 6, kind: input, shape index: {}]   ;;  %s1960_s7 = inlined_call_operand.hbm [shape: f32[2,8,32], index: 7, kind: output, shape index: {}]  }
   0x1   :  { %1965 = sst [smem:[#allocation19_spill]] %s1954_s1 }
   0x2   :  { %1966 = sst [smem:[#allocation20_spill]] %s1956_s3 }
   0x3   :  { %12 = vsyncpa [#allocation7], 0 }
   0x4   :  { %14 = vsyncpa [#allocation7 + $0x1], 0 }
   0x5   :  { %15 = vsyncpa [#allocation10], 0 }
   0x6   :  { %16 = vsyncpa [#allocation13], 0 }
   0x7   :  { %17 = vsyncpa [#allocation8], 0 }
   0x8   :  { %19 = vsyncpa [#allocation8 + $0x1], 0  ;;  %s1667_s24 = smov 0   ;;  %s1669_s25 = smov 0  }
   0x9   :  { %s1671_s26 = smov 0   ;;  %s1673_s27 = smov 0  }
   0xa LB: > { %s1688_s28 = sadd.s32 4294967295, %s1606_s27   ;;  %s1170_s29 = sadd.s32 4294967294, %s1606_s27   ;;  %s1606_s27 = sphi %s1673_s27, %s1988_s27   ;;  %s1602_s26 = sphi %s1671_s26, %s1987_s26   ;;  %s1598_s25 = sphi %s1669_s25, %s1986_s25   ;;  %s1594_s24 = sphi %s1667_s24, %s1985_s24  }
   0xb   : > { %p45_p0 = scmp.ne.s32.totalorder %s1598_s25, %s1594_s24  ;;  %p1961_p1 = scmp.eq.s32.totalorder %s1688_s28, 0 }
   0xc   : > { %p201_p3 = scmp.eq.s32.totalorder %s1170_s29, 1  ;;  %p1171_p5 = scmp.ge.s32.totalorder %s1606_s27, 1 }
   0xd   : > { %p1697_p4 = por %p1961_p1, %p45_p0  ;;  %p208_p7 = scmp.lt.s32.totalorder %s1606_s27, 3 }
   0xe   : > { %p1702_p6 = por %p201_p3, %p45_p0  ;;  %s1608_s10 = smov [#allocation9]  }
   0xf   : > { %s1967_s30 = scalar_select %p1697_p4, 1, 0 }
  0x10   : > { %s1968_s8 = scalar_select %p1702_p6, 1, 0 }
  0x11   : > { %p1707_p8 = pnand %p1171_p5, %p208_p7  ;;  %s220_s11 = sshll.u32 %s1608_s10, 4  ;;  %s221_s11 = int_to_ptr.vmem [resolvable:$true] %s220_s11 }
  0x12   : > { %s1609_s13 = smov [#allocation11]   ;;  %s1610_s15 = smov [#allocation12]  }
  0x13   : > { %s1969_s9 = scalar_select %p1707_p8, 1, 0 }
  0x14   : > { %p1331_p9 = pneg %p1707_p8  ;;  %s236_s14 = sshll.u32 %s1609_s13, 4  ;;  %s237_s14 = int_to_ptr.vmem [resolvable:$true] %s236_s14 }
  0x15   : > { %s252_s16 = sshll.u32 %s1610_s15, 4  ;;  %s1439_s17 = scalar_lea.vmem %s221_s11, 256  ;;  %s253_s16 = int_to_ptr.vmem [resolvable:$true] %s252_s16 }
  0x16   : > { %p1716_p11 = pnand %p1331_p9, %p1961_p1  ;;  %p1440_p13 = scmp.ne.s32.totalorder %s221_s11, %s1439_s17 }
  0x17   : > { %p1447_p5 = scmp.lt.s32.totalorder %s221_s11, %s221_s11  ;;  %p1448_p7 = scmp.lt.s32.totalorder %s1439_s17, %s1439_s17 }
  0x18   : > { %p1430_p12 = pneg %p1716_p11 }
  0x19   : > { %p1449_p9 = por %p1448_p7, %p1447_p5 }
  0x1a   : > { %p1442_p0 = pnand %p1440_p13, %p1430_p12 }
  0x1c   : > { %p1443_p3 = pneg %p1442_p0 }
  0x1e   : > { %p1450_p10 = pnand %p1449_p9, %p1443_p3 }
  0x20   : > { %1453 = shalt.err (!%p1450_p10)
}
  0x21   : > { %s1611_s18 = smov 64   ;;  %s1612_s19 = smov 4  }
  0x22   : > { %s1971_s1 = sld [smem:[#allocation19_spill]]  ;;  %s1465_s22 = scalar_lea.vmem %s237_s14, 256 }
  0x23   : > { %p1466_p1 = scmp.ne.s32.totalorder %s237_s14, %s1465_s22  ;;  %p1473_p2 = scmp.lt.s32.totalorder %s237_s14, %s237_s14 }
  0x24   : > { %p1474_p6 = scmp.lt.s32.totalorder %s1465_s22, %s1465_s22 }
  0x25   : > { %p1468_p13 = pnand %p1466_p1, %p1430_p12 }
  0x26   : > { %p1475_p5 = por %p1474_p6, %p1473_p2 }
  0x27   : > { %p1469_p0 = pneg %p1468_p13 }
  0x28   : > { %1334 = dma.hbm_to_vmem [thread:$0]  (!%p1716_p11), %s1971_s1, 256, %s221_s11, [#allocation10], %s1611_s18, %s1611_s18, %s1612_s19  }
  0x29   : > { %p1476_p3 = pnand %p1475_p5, %p1469_p0 }
  0x2b   : > { %1479 = shalt.err (!%p1476_p3)
}
  0x2c   : > { %s1972_s3 = sld [smem:[#allocation20_spill]]  ;;  %s1491_s10 = scalar_lea.vmem %s253_s16, 256 }
  0x2d   : > { %p1492_p10 = scmp.ne.s32.totalorder %s253_s16, %s1491_s10  ;;  %p1499_p9 = scmp.lt.s32.totalorder %s253_s16, %s253_s16 }
  0x2e   : > { %p1500_p13 = scmp.lt.s32.totalorder %s1491_s10, %s1491_s10 }
  0x2f   : > { %p1494_p7 = pnand %p1492_p10, %p1430_p12 }
  0x30   : > { %p1501_p4 = por %p1500_p13, %p1499_p9 }
  0x31   : > { %p1495_p1 = pneg %p1494_p7 }
  0x32   : > { %1337 = dma.hbm_to_vmem [thread:$0]  (!%p1716_p11), %s1972_s3, 256, %s237_s14, [#allocation10], %s1611_s18, %s1611_s18, %s1612_s19  }
  0x33   : > { %p1502_p2 = pnand %p1501_p4, %p1495_p1 }
  0x35   : > { %1505 = shalt.err (!%p1502_p2)
}
  0x36   : > { %1340 = dma.hbm_to_vmem [thread:$0]  (!%p1716_p11), %s1958_s5, 256, %s253_s16, [#allocation13], %s1611_s18, %s1611_s18, %s1612_s19  }
  0x37   : > { %s1747_s14 = sadd.s32 1, %s1606_s27   ;;  %s32_s12 = sadd.s32 1, %s1602_s26 }
  0x38   : > { %s29_s15 = ssub.s32 %s1606_s27, %s1747_s14  ;;  %p39_p6 = scmp.ne.s32.totalorder %s1602_s26, %s1598_s25 }
  0x39   : > { %p30_p4 = scmp.eq.s32.totalorder %s29_s15, 0  ;;  %p40_p12 = scmp.eq.s32.totalorder %s1606_s27, 0 }
  0x3a   : > { %p1352_p0 = scmp.lt.s32.totalorder %s1606_s27, 2  ;;  %p1973_p3 = scmp.eq.s32.totalorder %s1688_s28, 1 }
  0x3b   : > { %s1757_s17 = scalar_select %p30_p4, %s1602_s26, %s32_s12  }
  0x3c   : > { %p41_p5 = por %p40_p12, %p39_p6  ;;  %p1761_p10 = por %p1973_p3, %p39_p6 }
  0x3d   : > { %s269_s21 = sand.u32 1, %s1602_s26   ;;  %s1177_s22 = sshll.u32 %s1606_s27, 6 }
  0x3e   : > { %s1974_s20 = scalar_select %p1761_p10, 1, 0 }
  0x3f   : > { %s1176_s16 = sshll.u32 %s269_s21, 2  ;;  %s1770_s23 = scalar_lea.hbm %s1953_s0, %s1177_s22 }
  0x40   : > { %s273_s29 = scalar_lea.vmem [#allocation6], %s1176_s16  ;;  %p1772_p11 = pnand %p1352_p0, %p41_p5 }
  0x41   : > { %s280_s10 = sshll.u32 %s273_s29, 4  ;;  %s270_s13 = scalar_lea.sflag [#allocation7], %s269_s21  ;;  %s281_s10 = int_to_ptr.vmem [resolvable:$true] %s280_s10 }
  0x42   : > { %s1506_s15 = scalar_lea.hbm %s1770_s23, 64  ;;  %p1508_p1 = pneg %p1772_p11 }
  0x43   : > { %p1507_p7 = scmp.ne.s32.totalorder %s1770_s23, %s1506_s15  ;;  %s1511_s18 = scalar_lea.hbm %s1953_s0, 128 }
  0x44   : > { %p1512_p2 = scmp.lt.s32.totalorder %s1770_s23, %s1953_s0  ;;  %p1513_p4 = scmp.lt.s32.totalorder %s1511_s18, %s1506_s15 }
  0x45   : > { %p1509_p9 = pnand %p1508_p1, %p1507_p7 }
  0x46   : > { %p1514_p6 = por %p1513_p4, %p1512_p2 }
  0x47   : > { %p1510_p13 = pneg %p1509_p9 }
  0x49   : > { %p1515_p12 = pnand %p1514_p6, %p1510_p13 }
  0x4b   : > { %1518 = shalt.err (!%p1515_p12)
}
  0x4c   : > { %s1519_s29 = scalar_lea.vmem %s281_s10, 64  ;;  %s1613_s21 = smov [#allocation6]  }
  0x4d   : > { %p1520_p0 = scmp.ne.s32.totalorder %s281_s10, %s1519_s29  ;;  %s1524_s1 = sshll.u32 %s1613_s21, 4  ;;  %s1525_s1 = int_to_ptr.vmem [resolvable:$false] %s1524_s1 }
  0x4e   : > { %s1526_s3 = scalar_lea.vmem %s1525_s1, 128  ;;  %p1527_p7 = scmp.lt.s32.totalorder %s281_s10, %s1525_s1 }
  0x4f   : > { %p1522_p5 = pnand %p1520_p0, %p1508_p1  ;;  %p1528_p9 = scmp.lt.s32.totalorder %s1526_s3, %s1519_s29 }
  0x51   : > { %p1523_p3 = pneg %p1522_p5  ;;  %p1529_p10 = por %p1528_p9, %p1527_p7 }
  0x53   : > { %p1530_p8 = pnand %p1529_p10, %p1523_p3 }
  0x55   : > { %1533 = shalt.err (!%p1530_p8)
}
  0x56   : > { %1344 = dma.hbm_to_vmem [thread:$0]  (!%p1772_p11), %s1770_s23, 64, %s281_s10, %s270_s13  }
  0x57   : > { %p1976_p13 = scmp.ne.s32.totalorder %s1969_s9, 0 }
  0x58   : > { %s1793_s15 = sand.u32 (!%p1976_p13), 1, %s1598_s25   ;;  %p1977_p1 = scmp.ne.s32.totalorder (!%p1976_p13), %s1967_s30, 0 }
  0x59   : > { %289 = sbr.rel (%p1976_p13) target bundleno = 1487 (0x5cf), region = 48  ;;  %s1179_s12 = sshll.u32 (!%p1976_p13), %s1793_s15, 2 }
  0x5a   : > { %s292_s22 = scalar_lea.sflag (!%p1976_p13), [#allocation7], %s1793_s15  ;;  %s295_s1 = scalar_lea.vmem (!%p1976_p13), [#allocation6], %s1179_s12 }
  0x5e   : > { %1577 = dma.done.wait (%p1977_p1), %s292_s22, 64  }
  0x5f   : > { %1579 = vsyncadd (%p1977_p1), %s292_s22, 4294967232  ;;  %p1978_p8 = scmp.eq.s32.totalorder %s1688_s28, 0 }
  0x61   : > { %1581 = dma.done.wait (%p1978_p8), [#allocation10], 512   ;;  %p1979_p10 = pmov %p1978_p8 }
  0x62   : > { %p1980_p11 = pmov %p1978_p8 }
  0x63   : > { %1583 = vsyncadd (%p1979_p10), [#allocation10], 4294966784 }
  0x64   : > { %1585 = dma.done.wait (%p1980_p11), [#allocation13], 256   ;;  %p1981_p2 = pmov %p1978_p8 }
  0x65   : > { %v1614_v0 = vmov 0.0   ;;  %vm1615_vm0 = vmmov 0   ;;  %v1406_v1 = vld [vmem:[#allocation11 + $0x8] sm:$0xff]   ;;  %v1407_v2 = vld [vmem:[#allocation9 + $0x8] sm:$0xff]   ;;  %v1408_v3 = vld [vmem:[#allocation11] sm:$0xff]   ;;  %vm363_vm1 = vcmask 261120  }
  0x66   : > { %1587 = vsyncadd (%p1981_p2), [#allocation13], 4294967040  ;;  %1243 = vmatprep.subr.bf16.mxu0 %v1614_v0  ;;  %1251 = vmatprep.subr.bf16.mxu1 %v1614_v0  ;;  %v1409_v4 = vld [vmem:[#allocation9] sm:$0xff]   ;;  %v339_v5 = vld [vmem:[%s295_s1] sm:$0xf]  ;;  %vm408_vm2 = vcmask 60416  }
  0x67   : > { %1247 = vmatprep.mubr.msk.bf16.mxu0 %vm1615_vm0, %v1614_v0  ;;  %1255 = vmatprep.mubr.msk.bf16.mxu1 %vm1615_vm0, %v1614_v0  ;;  %v1184_v6 = vld [vmem:[%s1957_s4] ss:$0 sm:$0xff]  ;;  %s1616_s10 = smov 104   ;;  %s1617_s11 = smov 120   ;;  %vm538_vm3 = vcmask 64512   ;;  %vm778_vm4 = vcmask 1043456  }
  0x68   : > { %1244 = vmatpush3.bf16.msra.mxu0 %v1406_v1  ;;  %1252 = vmatpush3.bf16.msra.mxu1 %v1407_v2  ;;  %v1189_v7 = vld [vmem:[%s1955_s2] ss:$0 sm:$0xff]  ;;  %s1618_s13 = smov 112   ;;  %s1619_s18 = smov 96   ;;  %vm969_vm5 = vcmask 126016   ;;  %vm978_vm6 = vcmask 191616  }
  0x69   : > { %1245 = vmatprep.subr.bf16.mxu0 %v1614_v0  ;;  %1253 = vmatprep.subr.bf16.mxu1 %v1614_v0  ;;  %s1620_s19 = smov 80   ;;  %s1621_s16 = smov 72   ;;  %vm987_vm7 = vcmask 257216  }
  0x6a   : > { %s1622_s29 = smov 88   ;;  %s1623_s21 = smov 16  }
  0x6b   : > { %s1624_s12 = smov 8   ;;  %s1625_s22 = smov 24  }
  0x6c   : > { %1246 = vmatpush3.bf16.msra.mxu0 %v1408_v3  ;;  %1254 = vmatpush3.bf16.msra.mxu1 %v1409_v4  ;;  %s1183_s1 = sshll.u32 %s1793_s15, 3  ;;  %s1210_s9 = sshll.u32 %s1688_s28, 7 }
  0x6d   : > { %1259 = vmatprep.subr.bf16.mxu0 %v1614_v0  ;;  %1265 = vmatprep.subr.bf16.mxu1 %v1614_v0  ;;  %s337_s23 = scalar_lea.vmem [#allocation14], %s1183_s1  ;;  %p1982_p6 = scmp.ne.s32.totalorder %s1974_s20, 0 }
  0x6f   : > { %1248 = vmatmul.mubr.msk.bf16.vlgmr.msra.gmra.mxu0 %vm363_vm1, %v339_v5  ;;  %1256 = vmatmul.mubr.msk.bf16.vlgmr.msra.gmra.mxu1 %vm363_vm1, %v339_v5 }
  0x70   : > { %1261 = vmatprep.mubr.msk.bf16.mxu0 %vm1615_vm0, %v1614_v0  ;;  %1267 = vmatprep.mubr.msk.bf16.mxu1 %vm1615_vm0, %v1614_v0 }
 0x12f   : > { %v401_v8 = vpop.f32.mrf.mxu0  ;;  %v504_v10 = vpop.f32.mrf.mxu1 }
 0x130   : > { %v402_v9 = vadd.f32 %v1184_v6, %v401_v8  ;;  %v505_v12 = vadd.f32 %v1189_v7, %v504_v10 }
 0x131   : > { %v1249_v11 = vpop.f32.mrf.mxu0  ;;  %v1257_v14 = vpop.f32.mrf.mxu1 }
 0x132   : > { %v1831_v13 = vpack.c.bf16 %v402_v9, %v402_v9  ;;  %v510_v15 = vpack.c.bf16 %v505_v12, %v505_v12 }
 0x133   : > { %v404_v16 = vpop.f32.mrf.mxu0  ;;  %v507_v17 = vpop.f32.mrf.mxu1 }
 0x134   : > { %409 = vst.msk [vmem:[#allocation3] sm:$0xf] %vm408_vm2, %v1831_v13  ;;  %437 = vrot.lane.b32.xlu1 %v1831_v13, %s1616_s10  ;;  %417 = vrot.lane.b32.xlu0 %v1831_v13, %s1617_s11  ;;  %511 = vst.msk [vmem:[#allocation2] sm:$0xf] %vm408_vm2, %v510_v15 }
 0x135   : > { %v1250_v18 = vpop.f32.mrf.mxu0  ;;  %v1258_v19 = vpop.f32.mrf.mxu1 }
 0x138   : > { %515 = vrot.lane.b32.xlu1 %v510_v15, %s1617_s11  ;;  %427 = vrot.lane.b32.xlu0 %v1831_v13, %s1618_s13 }
 0x13b   : > { %v534_v20 = vld [vmem:[#allocation3] sm:$0xf]  ;;  %v530_v22 = vld [vmem:[#allocation2] sm:$0xf] }
 0x13c   : > { %525 = vrot.lane.b32.xlu1 %v510_v15, %s1616_s10  ;;  %520 = vrot.lane.b32.xlu0 %v510_v15, %s1618_s13  ;;  %v543_v21 = vsel %vm538_vm3, %v534_v20, 0  ;;  %s1071_s10 = sshll.u32 %s337_s23, 4  ;;  %s1911_s10 = int_to_ptr.vmem [resolvable:$true] %s1071_s10 }
 0x13d   : > { %1260 = vmatpush3.bf16.xpose.msra.mxu0 %v543_v21  ;;  %s1534_s28 = scalar_lea.vmem %s1911_s10, 128 }
 0x13e   : > { %1271 = vmatprep.subr.bf16.mxu0 %v1614_v0  ;;  %p1535_p4 = scmp.ne.s32.totalorder %s1911_s10, %s1534_s28 }
 0x140   : > { %p1536_p12 = pnand %p1535_p4, %p1982_p6 }
 0x142   : > { %p1537_p0 = pneg %p1536_p12 }
 0x144   : > { %1262 = vmatmul.mubr.msk.bf16.vlgmr.msra.gmra.mxu0 %vm538_vm3, %v530_v22 }
 0x145   : > { %1273 = vmatprep.mubr.msk.bf16.mxu0 %vm1615_vm0, %v1614_v0 }
 0x1a6   : > { %v438_v23 = vpop.permute.xlu1 %437  ;;  %v418_v24 = vpop.permute.xlu0 %417 }
 0x1a7   : > { %441 = vst.msk [vmem:[#allocation3 + $0xc] sm:$0xf] %vm408_vm2, %v438_v23  ;;  %421 = vst.msk [vmem:[#allocation3 + $0x4] sm:$0xf] %vm408_vm2, %v418_v24 }
 0x1aa   : > { %v516_v25 = vpop.permute.xlu1 %515  ;;  %v428_v26 = vpop.permute.xlu0 %427 }
 0x1ab   : > { %519 = vst.msk [vmem:[#allocation2 + $0x4] sm:$0xf] %vm408_vm2, %v516_v25  ;;  %431 = vst.msk [vmem:[#allocation3 + $0x8] sm:$0xf] %vm408_vm2, %v428_v26 }
 0x1ae   : > { %v526_v27 = vpop.permute.xlu1 %525  ;;  %v521_v28 = vpop.permute.xlu0 %520  ;;  %v535_v29 = vld [vmem:[#allocation3 + $0x4] sm:$0xf]  ;;  %v537_v34 = vld [vmem:[#allocation3 + $0xc] sm:$0xf] }
 0x1af   : > { %529 = vst.msk [vmem:[#allocation2 + $0xc] sm:$0xf] %vm408_vm2, %v526_v27  ;;  %524 = vst.msk [vmem:[#allocation2 + $0x8] sm:$0xf] %vm408_vm2, %v521_v28  ;;  %v589_v30 = vsel %vm538_vm3, %v535_v29, 0  ;;  %v681_v35 = vsel %vm538_vm3, %v537_v34, 0 }
 0x1b0   : > { %1266 = vmatpush3.bf16.xpose.msra.mxu1 %v589_v30 }
 0x1b1   : > { %1277 = vmatprep.subr.bf16.mxu1 %v1614_v0 }
 0x1b2   : > { %v536_v31 = vld [vmem:[#allocation3 + $0x8] sm:$0xf]  ;;  %v531_v33 = vld [vmem:[#allocation2 + $0x4] sm:$0xf] }
 0x1b3   : > { %v635_v32 = vsel %vm538_vm3, %v536_v31, 0 }
 0x1b4   : > { %1272 = vmatpush3.bf16.xpose.msra.mxu0 %v635_v32 }
 0x1b5   : > { %1283 = vmatprep.subr.bf16.mxu0 %v1614_v0 }
 0x1b6   : > { %v532_v36 = vld [vmem:[#allocation2 + $0x8] sm:$0xf]  ;;  %v533_v37 = vld [vmem:[#allocation2 + $0xc] sm:$0xf] }
 0x1b7   : > { %1268 = vmatmul.mubr.msk.bf16.vlgmr.msra.gmra.mxu1 %vm538_vm3, %v531_v33 }
 0x1b8   : > { %1278 = vmatpush3.bf16.xpose.msra.mxu1 %v681_v35  ;;  %1279 = vmatprep.mubr.msk.bf16.mxu1 %vm1615_vm0, %v1614_v0 }
 0x1b9   : > { %1289 = vmatprep.subr.bf16.mxu1 %v1614_v0 }
 0x1bb   : > { %1274 = vmatmul.mubr.msk.bf16.vlgmr.msra.gmra.mxu0 %vm538_vm3, %v532_v36 }
 0x1bc   : > { %1285 = vmatprep.mubr.msk.bf16.mxu0 %vm1615_vm0, %v1614_v0 }
 0x1bf   : > { %1280 = vmatmul.mubr.msk.bf16.vlgmr.msra.gmra.mxu1 %vm538_vm3, %v533_v37 }
 0x1c0   : > { %1291 = vmatprep.mubr.msk.bf16.mxu1 %vm1615_vm0, %v1614_v0 }
 0x204   : > { %v579_v38 = vpop.f32.mrf.mxu0 }
 0x205   : > { %v723_v39 = vsel %vm538_vm3, %v579_v38, -inf }
 0x206   : > { %724 = vmax.xlane.f32.xlu0 %v723_v39  ;;  %v1263_v40 = vpop.f32.mrf.mxu0 }
 0x208   : > { %v582_v41 = vpop.f32.mrf.mxu0 }
 0x20a   : > { %v1264_v42 = vpop.f32.mrf.mxu0 }
 0x277   : > { %v625_v43 = vpop.f32.mrf.mxu1 }
 0x278   : > { %v726_v44 = vsel %vm538_vm3, %v625_v43, -inf }
 0x279   : > { %727 = vmax.xlane.f32.xlu1 %v726_v44  ;;  %v1269_v45 = vpop.f32.mrf.mxu1 }
 0x27b   : > { %v628_v46 = vpop.f32.mrf.mxu1  ;;  %v671_v47 = vpop.f32.mrf.mxu0 }
 0x27c   : > { %v729_v48 = vsel %vm538_vm3, %v671_v47, -inf }
 0x27d   : > { %v1270_v49 = vpop.f32.mrf.mxu1  ;;  %730 = vmax.xlane.f32.xlu0 %v729_v48  ;;  %v1275_v50 = vpop.f32.mrf.mxu0  ;;  %v1410_v48 = vld [vmem:[#allocation12 + $0x8] sm:$0xff]  }
 0x27f   : > { %v674_v51 = vpop.f32.mrf.mxu0  ;;  %v717_v52 = vpop.f32.mrf.mxu1 }
 0x280   : > { %v732_v53 = vsel %vm538_vm3, %v717_v52, -inf  ;;  %v1411_v51 = vld [vmem:[#allocation12] sm:$0xff]  }
 0x281   : > { %v1281_v54 = vpop.f32.mrf.mxu1  ;;  %733 = vmax.xlane.f32.xlu0 %v732_v53  ;;  %v1276_v55 = vpop.f32.mrf.mxu0 }
 0x283   : > { %v720_v56 = vpop.f32.mrf.mxu1 }
 0x285   : > { %v1282_v57 = vpop.f32.mrf.mxu1 }
 0x28a   : > { %413 = vrot.lane.b32.xlu1 %v1831_v13, %s1619_s18  ;;  %s1909_s18 = scalar_lea.hbm %s1960_s7, %s1210_s9 }
 0x28f   : > { %v725_v58 = vpop.xlane.xlu0 %724 }
 0x290   : > { %v735_v59 = vsub.f32 %v579_v38, %v725_v58 }
 0x292   : > { %v739_v60 = vmul.f32 1.442695, %v735_v59 }
 0x294   : > { %1412 = vpow2.f32 %v739_v60 }
 0x2a1   : > { %v1413_v61 = vpop.eup %1412 }
 0x2a2   : > { %v747_v62 = vsel %vm538_vm3, %v1413_v61, 0.0 }
 0x2ae   : > { %748 = vadd.xlane.f32.xlu1 %v747_v62 }
 0x302   : > { %v728_v63 = vpop.xlane.xlu1 %727 }
 0x303   : > { %v736_v1 = vsub.f32 %v625_v43, %v728_v63 }
 0x305   : > { %v741_v2 = vmul.f32 1.442695, %v736_v1 }
 0x306   : > { %v414_v3 = vpop.permute.xlu1 %413  ;;  %v731_v4 = vpop.xlane.xlu0 %730 }
 0x307   : > { %1414 = vpow2.f32 %v741_v2  ;;  %416 = vst.msk [vmem:[#allocation4] sm:$0xf] %vm408_vm2, %v414_v3  ;;  %v737_v5 = vsub.f32 %v671_v47, %v731_v4 }
 0x309   : > { %v743_v6 = vmul.f32 1.442695, %v737_v5  ;;  %v1205_v5 = vld [vmem:[%s1959_s6] ss:$0 sm:$0xff] }
 0x30a   : > { %v734_v7 = vpop.xlane.xlu0 %733 }
 0x30b   : > { %1416 = vpow2.f32 %v743_v6  ;;  %v738_v8 = vsub.f32 %v717_v52, %v734_v7 }
 0x30d   : > { %v745_v9 = vmul.f32 1.442695, %v738_v8 }
 0x30e   : > { %v771_v10 = vld [vmem:[#allocation4] sm:$0xf] }
 0x30f   : > { %1418 = vpow2.f32 %v745_v9  ;;  %v780_v11 = vsel %vm778_vm4, %v771_v10, 0 }
 0x310   : > { %1284 = vmatpush3.bf16.msra.mxu0 %v780_v11 }
 0x311   : > { %1295 = vmatprep.subr.bf16.mxu0 %v1614_v0 }
 0x314   : > { %v1415_v12 = vpop.eup %1414 }
 0x315   : > { %v750_v14 = vsel %vm538_vm3, %v1415_v12, 0.0 }
 0x316   : > { %751 = vadd.xlane.f32.xlu0 %v750_v14 }
 0x318   : > { %v1417_v15 = vpop.eup %1416 }
 0x319   : > { %v753_v16 = vsel %vm538_vm3, %v1417_v15, 0.0 }
 0x31a   : > { %754 = vadd.xlane.f32.xlu1 %v753_v16 }
 0x31c   : > { %v1419_v17 = vpop.eup %1418 }
 0x31d   : > { %v756_v18 = vsel %vm538_vm3, %v1419_v17, 0.0 }
 0x31e   : > { %757 = vadd.xlane.f32.xlu0 %v756_v18 }
 0x32b   : > { %432 = vrot.lane.b32.xlu1 %v1831_v13, %s1620_s19  ;;  %s1058_s19 = scalar_lea.sflag [#allocation8], %s1793_s15 }
 0x32f   : > { %442 = vrot.lane.b32.xlu1 %v1831_v13, %s1621_s16  ;;  %s1626_s16 = smov [#allocation14]  }
 0x334   : > { %422 = vrot.lane.b32.xlu0 %v1831_v13, %s1622_s29  ;;  %s1538_s29 = sshll.u32 %s1626_s16, 4  ;;  %s1539_s29 = int_to_ptr.vmem [resolvable:$false] %s1538_s29 }
 0x335   : > { %p1541_p5 = scmp.lt.s32.totalorder %s1911_s10, %s1539_s29 }
 0x337   : > { %v749_v19 = vpop.xlane.xlu1 %748 }
 0x338   : > { %1420 = vrcp.f32 %v749_v19 }
 0x345   : > { %v1421_v20 = vpop.eup %1420 }
 0x346   : > { %v763_v21 = vmul.f32 %v1421_v20, %v1413_v61 }
 0x348   : > { %v767_v22 = vpack.c.bf16 %v763_v21, %v763_v21 }
 0x34a   : > { %1286 = vmatmul.mubr.msk.bf16.vlgmr.msra.gmra.mxu0 %vm538_vm3, %v767_v22 }
 0x34b   : > { %1297 = vmatprep.mubr.msk.bf16.mxu0 %vm1615_vm0, %v1614_v0 }
 0x39f   : > { %v752_v23 = vpop.xlane.xlu0 %751 }
 0x3a0   : > { %1422 = vrcp.f32 %v752_v23 }
 0x3a3   : > { %v755_v24 = vpop.xlane.xlu1 %754 }
 0x3a4   : > { %1424 = vrcp.f32 %v755_v24 }
 0x3a7   : > { %v433_v25 = vpop.permute.xlu1 %432  ;;  %v758_v26 = vpop.xlane.xlu0 %757 }
 0x3a8   : > { %436 = vst.msk [vmem:[#allocation4 + $0x8] sm:$0xf] %vm408_vm2, %v433_v25  ;;  %1426 = vrcp.f32 %v758_v26 }
 0x3ab   : > { %v443_v13 = vpop.permute.xlu1 %442  ;;  %v423_v27 = vpop.permute.xlu0 %422 }
 0x3ac   : > { %446 = vst.msk [vmem:[#allocation4 + $0xc] sm:$0xf] %vm408_vm2, %v443_v13  ;;  %426 = vst.msk [vmem:[#allocation4 + $0x4] sm:$0xf] %vm408_vm2, %v423_v27 }
 0x3ad   : > { %v1423_v28 = vpop.eup %1422 }
 0x3ae   : > { %v764_v33 = vmul.f32 %v1423_v28, %v1415_v12 }
 0x3af   : > { %v773_v29 = vld [vmem:[#allocation4 + $0x8] sm:$0xf] }
 0x3b0   : > { %v872_v30 = vsel %vm778_vm4, %v773_v29, 0  ;;  %v768_v38 = vpack.c.bf16 %v764_v33, %v764_v33 }
 0x3b1   : > { %v1425_v31 = vpop.eup %1424  ;;  %1296 = vmatpush3.bf16.msra.mxu0 %v872_v30 }
 0x3b2   : > { %v765_v32 = vmul.f32 %v1425_v31, %v1417_v15  ;;  %1307 = vmatprep.subr.bf16.mxu0 %v1614_v0 }
 0x3b3   : > { %v772_v34 = vld [vmem:[#allocation4 + $0x4] sm:$0xf]  ;;  %v774_v37 = vld [vmem:[#allocation4 + $0xc] sm:$0xf] }
 0x3b4   : > { %v826_v35 = vsel %vm778_vm4, %v772_v34, 0  ;;  %v769_v36 = vpack.c.bf16 %v765_v32, %v765_v32  ;;  %v918_v40 = vsel %vm778_vm4, %v774_v37, 0 }
 0x3b5   : > { %1290 = vmatpush3.bf16.msra.mxu1 %v826_v35  ;;  %v1427_v39 = vpop.eup %1426 }
 0x3b6   : > { %1298 = vmatmul.mubr.msk.bf16.vlgmr.msra.gmra.mxu0 %vm538_vm3, %v769_v36  ;;  %1301 = vmatprep.subr.bf16.mxu1 %v1614_v0  ;;  %v766_v41 = vmul.f32 %v1427_v39, %v1419_v17 }
 0x3b7   : > { %1311 = vmatprep.mubr.msk.bf16.mxu0 %vm1615_vm0, %v1614_v0  ;;  %1308 = vmatpush3.bf16.msra.mxu0 %v1410_v48 }
 0x3b8   : > { %1292 = vmatmul.mubr.msk.bf16.vlgmr.msra.gmra.mxu1 %vm538_vm3, %v768_v38  ;;  %v770_v42 = vpack.c.bf16 %v766_v41, %v766_v41  ;;  %1309 = vmatprep.subr.bf16.mxu0 %v1614_v0 }
 0x3b9   : > { %1302 = vmatpush3.bf16.msra.mxu1 %v918_v40  ;;  %1303 = vmatprep.mubr.msk.bf16.mxu1 %vm1615_vm0, %v1614_v0 }
 0x3bb   : > { %1310 = vmatpush3.bf16.msra.mxu0 %v1411_v51 }
 0x3c0   : > { %1304 = vmatmul.mubr.msk.bf16.vlgmr.msra.gmra.mxu1 %vm538_vm3, %v770_v42 }
 0x40a   : > { %v816_v43 = vpop.f32.mrf.mxu0 }
 0x40b   : > { %v960_v44 = vpack.c.bf16 %v816_v43, %v816_v43 }
 0x40c   : > { %v1287_v45 = vpop.f32.mrf.mxu0 }
 0x40d   : > { %961 = vst.msk [vmem:[#allocation5] sm:$0xf] %vm408_vm2, %v960_v44 }
 0x40e   : > { %v819_v46 = vpop.f32.mrf.mxu0 }
 0x410   : > { %v1288_v47 = vpop.f32.mrf.mxu0 }
 0x476   : > { %v908_v49 = vpop.f32.mrf.mxu0 }
 0x477   : > { %v1216_v50 = vpack.c.bf16 %v908_v49, %v908_v49 }
 0x478   : > { %v862_v52 = vpop.f32.mrf.mxu1  ;;  %v1299_v53 = vpop.f32.mrf.mxu0 }
 0x479   : > { %v1215_v54 = vpack.c.bf16 %v862_v52, %v862_v52  ;;  %975 = vrot.lane.b32.xlu1 %v1216_v50, %s1623_s21  ;;  %s1540_s21 = scalar_lea.vmem %s1539_s29, 256 }
 0x47a   : > { %v1293_v55 = vpop.f32.mrf.mxu1  ;;  %v911_v56 = vpop.f32.mrf.mxu0  ;;  %p1542_p3 = scmp.lt.s32.totalorder %s1540_s21, %s1534_s28 }
 0x47b   : > { %966 = vrot.lane.b32.xlu0 %v1215_v54, %s1624_s12 }
 0x47c   : > { %v865_v57 = vpop.f32.mrf.mxu1  ;;  %v1300_v58 = vpop.f32.mrf.mxu0  ;;  %p1543_p7 = por %p1542_p3, %p1541_p5 }
 0x47e   : > { %v1294_v59 = vpop.f32.mrf.mxu1  ;;  %p1544_p9 = pnand %p1543_p7, %p1537_p0 }
 0x480   : > { %v954_v60 = vpop.f32.mrf.mxu1 }
 0x481   : > { %v1217_v61 = vpack.c.bf16 %v954_v60, %v954_v60 }
 0x482   : > { %v1305_v62 = vpop.f32.mrf.mxu1 }
 0x483   : > { %984 = vrot.lane.b32.xlu0 %v1217_v61, %s1625_s22 }
 0x484   : > { %v957_v63 = vpop.f32.mrf.mxu1 }
 0x486   : > { %v1306_v0 = vpop.f32.mrf.mxu1 }
 0x4eb   : > { %v976_v2 = vpop.permute.xlu1 %975 }
 0x4ed   : > { %v967_v1 = vpop.permute.xlu0 %966 }
 0x4ee   : > { %970 = vst.msk [vmem:[#allocation5] sm:$0xf] %vm969_vm5, %v967_v1 }
 0x4ef   : > { %979 = vst.msk [vmem:[#allocation5] sm:$0xf] %vm978_vm6, %v976_v2 }
 0x4f5   : > { %v985_v3 = vpop.permute.xlu0 %984 }
 0x4f6   : > { %988 = vst.msk [vmem:[#allocation5] sm:$0xf] %vm987_vm7, %v985_v3 }
 0x4fd   : > { %v989_v4 = vld [vmem:[#allocation5] sm:$0xf] }
 0x4fe   : > { %1312 = vmatmul.mubr.msk.bf16.vlgmr.msra.gmra.mxu0 %vm363_vm1, %v989_v4 }
 0x5be   : > { %v1050_v6 = vpop.f32.mrf.mxu0 }
 0x5bf   : > { %v1051_v7 = vadd.f32 %v1205_v5, %v1050_v6 }
 0x5c0   : > { %v1313_v8 = vpop.f32.mrf.mxu0 }
 0x5c1   : > { %1056 = vst.msk [vmem:[%s337_s23] sm:$0xff] %vm363_vm1, %v1051_v7 }
 0x5c2   : > { %v1053_v9 = vpop.f32.mrf.mxu0 }
 0x5c3   : > { %1547 = shalt.err (!%p1544_p9)
}
 0x5c4   : > { %s1548_s12 = scalar_lea.hbm %s1909_s18, 128  ;;  %s1552_s1 = scalar_lea.hbm %s1960_s7, 256 }
 0x5c5   : > { %p1549_p13 = scmp.ne.s32.totalorder %s1909_s18, %s1548_s12  ;;  %p1553_p10 = scmp.lt.s32.totalorder %s1909_s18, %s1960_s7 }
 0x5c6   : > { %p1554_p11 = scmp.lt.s32.totalorder %s1552_s1, %s1548_s12 }
 0x5c7   : > { %p1550_p1 = pnand %p1549_p13, %p1982_p6 }
 0x5c8   : > { %p1555_p2 = por %p1554_p11, %p1553_p10 }
 0x5c9   : > { %p1551_p8 = pneg %p1550_p1 }
 0x5cb   : > { %p1556_p4 = pnand %p1555_p2, %p1551_p8 }
 0x5cd   : > { %1559 = shalt.err (!%p1556_p4)
}
 0x5ce   : > { %1329 = dma.vmem_to_hbm [thread:$0]  (%p1982_p6), %s1911_s10, 128, %s1909_s18, %s1058_s19   ;;  %v1314_v10 = vpop.f32.mrf.mxu0 }
 0x5cf PF: > { %s1083_s9 = sand.u32 1, %s1594_s24   ;;  %p1983_p12 = scmp.ne.s32.totalorder %s1968_s8, 0 }
 0x5d0   : > { %p1984_p0 = scmp.ge.s32.totalorder %s1606_s27, 2  ;;  %s1084_s23 = scalar_lea.sflag [#allocation8], %s1083_s9 }
 0x5d2   : > { %p1346_p5 = pnand %p1984_p0, %p1983_p12 }
 0x5d4   : > { %p1347_p3 = pneg %p1346_p5 }
 0x5d6   : > { %1589 = dma.done.wait (%p1347_p3), %s1084_s23, 128  }
 0x5d7   : > { %1591 = vsyncadd (%p1347_p3), %s1084_s23, 4294967168  ;;  %p22_p7 = scmp.ge.s32.totalorder %s1747_s14, 4   ;;  %s1985_s24 = smov %s1598_s25 }
 0x5d8   : > { %s1986_s25 = smov %s1602_s26  ;;  %s1987_s26 = smov %s1757_s17 }
 0x5d9   : > { %s1988_s27 = smov %s1747_s14  ;;  %24 = sbr.rel (!%p22_p7) target bundleno = 10 (0xa), region = 114 }
 0x5de   :  { %1089 = vsyncpa [#allocation7], 1 }
 0x5df   :  { %1091 = vsyncpa [#allocation7 + $0x1], 1 }
 0x5e0   :  { %1092 = vsyncpa [#allocation10], 1 }
 0x5e1   :  { %1093 = vsyncpa [#allocation13], 1 }
 0x5e2   :  { %1094 = vsyncpa [#allocation8], 1 }
 0x5e3   :  { %1096 = vsyncpa [#allocation8 + $0x1], 1 }

</bundles_post_ra>
